<compile_context>
chip_gen: v7x
topology: tpu7x:2x2x1
jax: 0.10.0
libtpu: 0.0.40
codegen_flags: <defaults>
</compile_context>

<pallas_src>
import jax
import jax.numpy as jnp
from jax.experimental import pallas as pl
from jax.experimental.pallas import tpu as pltpu


def _round_up(n: int, m: int) -> int:
    return ((n + m - 1) // m) * m


def pooler_kernel(x_ref, w_ref, b_ref, o_ref):
    # x_ref: (TR, Hp)  activation rows (lane dim = hidden, padded to 128)
    # w_ref: (Hp, TN)  weight pre-transposed to (in, out) layout
    # b_ref: (1,  TN)  bias slab
    # o_ref: (TR, TN)  tanh(x @ W^T + b)
    y = jnp.dot(x_ref[...], w_ref[...],
                preferred_element_type=jnp.float32)   # f32 MXU accumulation
    y = y + b_ref[...].astype(jnp.float32)            # f32 epilogue
    # f32 tanh (EUP slot) is safe on every generation; the bf16-tanh micro-opt
    # for v6e/v7x is skipped (mostly hidden by the pipeline, <few % at best).
    o_ref[...] = jnp.tanh(y).astype(o_ref.dtype)


def _vmem_budgets():
    """Per-generation VMEM limits derived from the actual chip."""
    try:
        cap = int(getattr(pltpu.get_tpu_info(), "vmem_capacity_bytes", 0)) or (64 << 20)
    except Exception:                       # e.g. interpret mode / no chip info
        cap = 64 << 20
    # ~62.5% of physical as the compiler limit (80 MiB on 128-MiB v5e/v6e,
    # 40 MiB on 64-MiB v7x) and ~85% of that as our own working-set budget to
    # leave room for compiler scratch.
    vmem_limit = min(int(cap * 0.625), 100 << 20)
    budget = int(vmem_limit * 0.85)
    return budget, vmem_limit


def pooler_forward(hidden_states, weight, bias, *, row_tile=512, mxu_dtype=None):
    """hidden_states: (..., H); weight: (H, H) in PyTorch nn.Linear (out, in)
    layout; bias: (H,).  Returns tanh(hidden_states @ weight.T + bias)."""
    orig_shape = hidden_states.shape
    H = orig_shape[-1]
    out_dtype = hidden_states.dtype
    mm_dtype = jnp.dtype(mxu_dtype) if mxu_dtype is not None else jnp.dtype(out_dtype)
    dsize = mm_dtype.itemsize

    x2d = hidden_states.reshape(-1, H).astype(mm_dtype)
    R = x2d.shape[0]

    # One-time transpose to (in, out) layout -> plain row-major contraction in
    # the kernel (no per-step XLU transpose of the weight on the hot path).
    w = weight.T.astype(mm_dtype)            # (H_in, H_out)
    b = bias.reshape(1, H).astype(mm_dtype)

    # Pad the hidden (lane) dim up to a multiple of 128 (no-op for 768/1024/...).
    Hp = _round_up(max(H, 128), 128)         # contraction dim (x cols / w rows)
    Np = Hp                                  # output-feature dim (w cols / out cols)
    if Hp != H:
        x2d = jnp.pad(x2d, ((0, 0), (0, Hp - H)))
        w = jnp.pad(w, ((0, Hp - H), (0, Np - H)))
        b = jnp.pad(b, ((0, 0), (0, Np - H)))

    budget, vmem_limit = _vmem_budgets()

    # ---- output-column tile TN: resident weight if it fits, else stream slabs
    if Hp * Np * dsize <= budget // 2:
        TN = Np
        w_nbuf = 1                           # constant block -> single buffer
    else:
        w_nbuf = 2                           # streamed columns -> double buffer
        TN = min(256, Np)
        while TN * 2 <= Np and w_nbuf * Hp * (TN * 2) * dsize <= budget // 2:
            TN *= 2

    # ---- row tile TR against the VMEM budget (f32 intermediate included) ----
    def working_set(tr):
        return ((2 * tr * Hp                 # x, double-buffered
                 + 2 * tr * TN               # out, double-buffered
                 + w_nbuf * Hp * TN          # weight
                 + w_nbuf * TN) * dsize      # bias
                + tr * TN * 4)               # f32 matmul intermediate `y`

    TR = min(row_tile, _round_up(R, 8))
    if TR > 256:
        TR = (TR // 256) * 256               # MXU-friendly multiples of 256
    while TR > 16 and working_set(TR) > budget:
        TR = TR - 256 if TR > 256 else max(16, TR // 2)
    TR = max(8, _round_up(TR, 8))

    grid = (pl.cdiv(R, TR), pl.cdiv(Np, TN))
    single_buffer_w = (grid[1] == 1)         # constant weight/bias index_map

    def run(use_single_buffer):
        w_kw = dict(pipeline_mode=pl.Buffered(1)) if use_single_buffer else {}
        in_specs = [
            pl.BlockSpec((TR, Hp), lambda i, j: (i, 0)),           # activations
            pl.BlockSpec((Hp, TN), lambda i, j: (0, j), **w_kw),   # weight
            pl.BlockSpec((1, TN), lambda i, j: (0, j), **w_kw),    # bias
        ]
        out_specs = pl.BlockSpec((TR, TN), lambda i, j: (i, j))
        return pl.pallas_call(
            pooler_kernel,
            out_shape=jax.ShapeDtypeStruct((R, Np), out_dtype),
            grid=grid,
            in_specs=in_specs,
            out_specs=out_specs,
            compiler_params=pltpu.CompilerParams(
                # No reduction axis: every output block is independent, so both
                # axes are "parallel" (v7x megacore can split rows OR columns,
                # covering the tiny-R CLS-pooling case).
                dimension_semantics=("parallel", "parallel"),
                vmem_limit_bytes=vmem_limit,
            ),
            cost_estimate=pl.CostEstimate(
                flops=2 * R * H * H,
                transcendentals=R * H,
                bytes_accessed=(2 * R * H + H * H + H) * dsize,
            ),
        )(x2d, w, b)

    if single_buffer_w:
        try:
            out = run(True)
        except Exception:
            # Safety net if single-buffering via pl.Buffered(1) is rejected on
            # this JAX version: fall back to default double-buffering.
            out = run(False)
    else:
        out = run(False)

    if Np != H:
        out = out[:, :H]
    return out.reshape(orig_shape)


if __name__ == "__main__":
    # Small shapes consistent with the module: batch=2, seq=8, hidden=32
    B, S, H = 2, 8, 32
    key = jax.random.PRNGKey(0)
    k_x, k_w, k_b = jax.random.split(key, 3)

    hidden_states = jax.random.normal(k_x, (B, S, H), dtype=jnp.float32)
    # Deterministic parameter init (synthetic; mimics nn.Linear uniform range)
    bound = 1.0 / (H ** 0.5)
    weight = jax.random.uniform(k_w, (H, H), jnp.float32, -bound, bound)  # (out, in)
    bias = jax.random.uniform(k_b, (H,), jnp.float32, -bound, bound)

    out = pooler_forward(hidden_states, weight, bias)
    jax.block_until_ready(out)

    # Reference check in plain JAX
    ref = jnp.tanh(hidden_states @ weight.T + bias)
    assert out.shape == hidden_states.shape
    assert jnp.allclose(out, ref, atol=1e-5, rtol=1e-5), float(jnp.max(jnp.abs(out - ref)))

    print("KERNEL_OK")
</pallas_src>

<mosaic_0001>
module attributes {stable_mosaic.version = 11 : i64} {
  func.func @pooler_kernel(%arg0: i32, %arg1: i32, %arg2: memref<16x128xf32, #tpu.memory_space<vmem>>, %arg3: memref<128x128xf32, #tpu.memory_space<vmem>>, %arg4: memref<1x128xf32, #tpu.memory_space<vmem>>, %arg5: memref<16x128xf32, #tpu.memory_space<vmem>>) attributes {dimension_semantics = [#tpu.dimension_semantics<parallel>, #tpu.dimension_semantics<parallel>], iteration_bounds = array<i64: 1, 1>, scalar_prefetch = 0 : i64, scratch_operands = 0 : i64, tpu.core_type = #tpu.core_type<tc>, window_params = [{transform_indices = @transform_0, window_bounds = array<i64: 16, 128>}, {pipeline_mode = #tpu.pipeline_mode<synchronous>, transform_indices = @transform_1, window_bounds = array<i64: 128, 128>}, {pipeline_mode = #tpu.pipeline_mode<synchronous>, transform_indices = @transform_2, window_bounds = array<i64: 1, 128>}, {transform_indices = @transform_3, window_bounds = array<i64: 16, 128>}]} {
    %c0 = arith.constant 0 : index
    %c0_0 = arith.constant 0 : index
    %0 = vector.load %arg2[%c0, %c0_0] : memref<16x128xf32, #tpu.memory_space<vmem>>, vector<16x128xf32>
    %c0_1 = arith.constant 0 : index
    %c0_2 = arith.constant 0 : index
    %1 = vector.load %arg3[%c0_1, %c0_2] : memref<128x128xf32, #tpu.memory_space<vmem>>, vector<128x128xf32>
    %cst = arith.constant dense<0.000000e+00> : vector<16x128xf32>
    %2 = tpu.matmul %0, %1, %cst {dimension_numbers = #tpu.dot_dimension_numbers<[1], [0], [0], [1], [0, 0, 1, 1], [], []>} : vector<16x128xf32>, vector<128x128xf32>, vector<16x128xf32> -> vector<16x128xf32>
    %c0_3 = arith.constant 0 : index
    %c0_4 = arith.constant 0 : index
    %3 = vector.load %arg4[%c0_3, %c0_4] : memref<1x128xf32, #tpu.memory_space<vmem>>, vector<1x128xf32>
    %4 = vector.broadcast %3 : vector<1x128xf32> to vector<16x128xf32>
    %5 = arith.addf %2, %4 : vector<16x128xf32>
    %6 = math.tanh %5 : vector<16x128xf32>
    %c0_5 = arith.constant 0 : index
    %c0_6 = arith.constant 0 : index
    %7 = vector.load %arg5[%c0_5, %c0_6] : memref<16x128xf32, #tpu.memory_space<vmem>>, vector<16x128xf32>
    tpu.vector_store %arg5[%c0_5, %c0_6], %6 {strides = array<i32>} : memref<16x128xf32, #tpu.memory_space<vmem>>, vector<16x128xf32>,
    return
  }
  func.func @transform_0(%arg0: i32, %arg1: i32) -> (i32, i32) {
    %c0_i32 = arith.constant 0 : i32
    %c0_i32_0 = arith.constant 0 : i32
    return %arg0, %c0_i32 : i32, i32
  }
  func.func @transform_1(%arg0: i32, %arg1: i32) -> (i32, i32) {
    %c0_i32 = arith.constant 0 : i32
    %c0_i32_0 = arith.constant 0 : i32
    return %c0_i32, %arg1 : i32, i32
  }
  func.func @transform_2(%arg0: i32, %arg1: i32) -> (i32, i32) {
    %c0_i32 = arith.constant 0 : i32
    %c0_i32_0 = arith.constant 0 : i32
    return %c0_i32, %arg1 : i32, i32
  }
  func.func @transform_3(%arg0: i32, %arg1: i32) -> (i32, i32) {
    %c0_i32 = arith.constant 0 : i32
    return %arg0, %arg1 : i32, i32
  }
}

module attributes {stable_mosaic.version = 11 : i64} {
  func.func @pooler_kernel(%arg0: i32, %arg1: i32, %arg2: memref<16x128xf32, #tpu.memory_space<vmem>>, %arg3: memref<128x128xf32, #tpu.memory_space<vmem>>, %arg4: memref<1x128xf32, #tpu.memory_space<vmem>>, %arg5: memref<16x128xf32, #tpu.memory_space<vmem>>) attributes {dimension_semantics = [#tpu.dimension_semantics<parallel>, #tpu.dimension_semantics<parallel>], iteration_bounds = array<i64: 1, 1>, scalar_prefetch = 0 : i64, scratch_operands = 0 : i64, tpu.core_type = #tpu.core_type<tc>, window_params = [{transform_indices = @transform_0, window_bounds = array<i64: 16, 128>}, {transform_indices = @transform_1, window_bounds = array<i64: 128, 128>}, {transform_indices = @transform_2, window_bounds = array<i64: 1, 128>}, {transform_indices = @transform_3, window_bounds = array<i64: 16, 128>}]} {
    %c0 = arith.constant 0 : index
    %c0_0 = arith.constant 0 : index
    %0 = vector.load %arg2[%c0, %c0_0] : memref<16x128xf32, #tpu.memory_space<vmem>>, vector<16x128xf32>
    %c0_1 = arith.constant 0 : index
    %c0_2 = arith.constant 0 : index
    %1 = vector.load %arg3[%c0_1, %c0_2] : memref<128x128xf32, #tpu.memory_space<vmem>>, vector<128x128xf32>
    %cst = arith.constant dense<0.000000e+00> : vector<16x128xf32>
    %2 = tpu.matmul %0, %1, %cst {dimension_numbers = #tpu.dot_dimension_numbers<[1], [0], [0], [1], [0, 0, 1, 1], [], []>} : vector<16x128xf32>, vector<128x128xf32>, vector<16x128xf32> -> vector<16x128xf32>
    %c0_3 = arith.constant 0 : index
    %c0_4 = arith.constant 0 : index
    %3 = vector.load %arg4[%c0_3, %c0_4] : memref<1x128xf32, #tpu.memory_space<vmem>>, vector<1x128xf32>
    %4 = vector.broadcast %3 : vector<1x128xf32> to vector<16x128xf32>
    %5 = arith.addf %2, %4 : vector<16x128xf32>
    %6 = math.tanh %5 : vector<16x128xf32>
    %c0_5 = arith.constant 0 : index
    %c0_6 = arith.constant 0 : index
    %7 = vector.load %arg5[%c0_5, %c0_6] : memref<16x128xf32, #tpu.memory_space<vmem>>, vector<16x128xf32>
    tpu.vector_store %arg5[%c0_5, %c0_6], %6 {strides = array<i32>} : memref<16x128xf32, #tpu.memory_space<vmem>>, vector<16x128xf32>,
    return
  }
  func.func @transform_0(%arg0: i32, %arg1: i32) -> (i32, i32) {
    %c0_i32 = arith.constant 0 : i32
    %c0_i32_0 = arith.constant 0 : i32
    return %arg0, %c0_i32 : i32, i32
  }
  func.func @transform_1(%arg0: i32, %arg1: i32) -> (i32, i32) {
    %c0_i32 = arith.constant 0 : i32
    %c0_i32_0 = arith.constant 0 : i32
    return %c0_i32, %arg1 : i32, i32
  }
  func.func @transform_2(%arg0: i32, %arg1: i32) -> (i32, i32) {
    %c0_i32 = arith.constant 0 : i32
    %c0_i32_0 = arith.constant 0 : i32
    return %c0_i32, %arg1 : i32, i32
  }
  func.func @transform_3(%arg0: i32, %arg1: i32) -> (i32, i32) {
    %c0_i32 = arith.constant 0 : i32
    return %arg0, %arg1 : i32, i32
  }
}

</mosaic_0001>

<bundles_post_ra>
// kernel: tpu_custom_call.1
= control target key start
LH: loop header
LB: loop body
LE: loop exit
PB: predicated region body
PF: predicated region fallthrough
CT: control target
= control target key end

     0   :  { %8 = vsyncpa [#allocation3], 0  ;;  %s405_s0 = inlined_call_operand.hbm [shape: f32[16,128], index: 0, kind: input, shape index: {}]   ;;  %s406_s1 = inlined_call_operand.hbm [shape: f32[128,128], index: 1, kind: input, shape index: {}]   ;;  %s407_s2 = inlined_call_operand.vmem [shape: f32[1,128], index: 2, kind: input, shape index: {}]   ;;  %s408_s3 = inlined_call_operand.hbm [shape: f32[16,128], index: 3, kind: output, shape index: {}]  }
   0x1   :  { %9 = vsyncpa [#allocation6], 0 }
   0x2   :  { %10 = vsyncpa [#allocation4], 0  ;;  %s332_s12 = smov [#allocation2]   ;;  %s260_s16 = scalar_lea.hbm %s405_s0, 256 }
   0x3   :  { %s16_s13 = sshll.u32 %s332_s12, 4  ;;  %p261_p0 = scmp.ne.s32.totalorder %s405_s0, %s260_s16  ;;  %s17_s13 = int_to_ptr.vmem [resolvable:$true] %s16_s13 }
   0x4   :  { %p264_p1 = scmp.lt.u32.totalorder %s260_s16, %s405_s0 }
   0x6   :  { %p266_p2 = pnand %p264_p1, %p261_p0 }
   0x8   :  { %269 = shalt.err (!%p266_p2)
}
   0x9   :  { %s270_s21 = scalar_lea.vmem %s17_s13, 256  ;;  %p275_p4 = scmp.lt.s32.totalorder %s17_s13, %s17_s13 }
   0xa   :  { %p271_p3 = scmp.ne.s32.totalorder %s17_s13, %s270_s21  ;;  %p276_p5 = scmp.lt.s32.totalorder %s270_s21, %s270_s21 }
   0xc   :  { %p277_p6 = por %p276_p5, %p275_p4 }
   0xe   :  { %p278_p7 = pnand %p277_p6, %p271_p3 }
  0x10   :  { %281 = shalt.err (!%p278_p7)
}
  0x11   :  { %s333_s22 = smov 128   ;;  %s334_s23 = smov 8  }
  0x12   :  { %22 = dma.hbm_to_vmem [thread:$0]  %s405_s0, 256, %s17_s13, [#allocation3], %s333_s22, %s333_s22, %s334_s23  }
  0x13   :  { %s335_s26 = smov [#allocation5]   ;;  %s282_s30 = scalar_lea.hbm %s406_s1, 2048 }
  0x14   :  { %s28_s27 = sshll.u32 %s335_s26, 4  ;;  %p283_p8 = scmp.ne.s32.totalorder %s406_s1, %s282_s30  ;;  %s29_s27 = int_to_ptr.vmem [resolvable:$true] %s28_s27 }
  0x15   :  { %p286_p9 = scmp.lt.u32.totalorder %s282_s30, %s406_s1 }
  0x17   :  { %p288_p10 = pnand %p286_p9, %p283_p8 }
  0x19   :  { %291 = shalt.err (!%p288_p10)
}
  0x1a   :  { %s292_s8 = scalar_lea.vmem %s29_s27, 2048  ;;  %p297_p12 = scmp.lt.s32.totalorder %s29_s27, %s29_s27 }
  0x1b   :  { %p293_p11 = scmp.ne.s32.totalorder %s29_s27, %s292_s8  ;;  %p298_p13 = scmp.lt.s32.totalorder %s292_s8, %s292_s8 }
  0x1d   :  { %p299_p0 = por %p298_p13, %p297_p12 }
  0x1f   :  { %p300_p1 = pnand %p299_p0, %p293_p11 }
  0x21   :  { %303 = shalt.err (!%p300_p1)
}
  0x22   :  { %34 = dma.hbm_to_vmem [thread:$0]  %s406_s1, 2048, %s29_s27, [#allocation6], %s333_s22, %s333_s22, %s334_s23  }
  0x23   :  { %326 = dma.done.wait [#allocation3], 256  }
  0x24   :  { %327 = vsyncadd [#allocation3], 4294967040 }
  0x25   :  { %328 = dma.done.wait [#allocation6], 2048  }
  0x26   :  { %329 = vsyncadd [#allocation6], 4294965248  ;;  %v45_v0 = vld [vmem:[#allocation5] sm:$0xff]  ;;  %v46_v1 = vld [vmem:[#allocation5 + $0x8] sm:$0xff]  ;;  %s336_s11 = smov [#allocation7]  }
  0x27   :  { %v47_v2 = vld [vmem:[#allocation5 + $0x10] sm:$0xff]  ;;  %v219_v3 = vpack.c.bf16 %v46_v1, %v45_v0  ;;  %v48_v4 = vld [vmem:[#allocation5 + $0x18] sm:$0xff]  ;;  %v49_v6 = vld [vmem:[#allocation5 + $0x20] sm:$0xff]  ;;  %s152_s12 = sshll.u32 %s336_s11, 4  ;;  %s153_s12 = int_to_ptr.vmem [resolvable:$true] %s152_s12 }
  0x28   :  { %v223_v5 = vpack.c.bf16 %v48_v4, %v47_v2  ;;  %v50_v7 = vld [vmem:[#allocation5 + $0x28] sm:$0xff]  ;;  %v43_v9 = vld [vmem:[#allocation2] sm:$0xff]  ;;  %v52_v11 = vld [vmem:[#allocation5 + $0x38] sm:$0xff]  ;;  %s304_s13 = scalar_lea.vmem %s153_s12, 256  ;;  %p309_p3 = scmp.lt.s32.totalorder %s153_s12, %s153_s12 }
  0x29   :  { %220 = vmatprep.subr.bf16.mxu0 %v219_v3  ;;  %v227_v8 = vpack.c.bf16 %v50_v7, %v49_v6  ;;  %v51_v10 = vld [vmem:[#allocation5 + $0x30] sm:$0xff]  ;;  %216 = vmatprep.mubr.f32.mxu0 %v43_v9  ;;  %v53_v13 = vld [vmem:[#allocation5 + $0x40] sm:$0xff]  ;;  %v54_v14 = vld [vmem:[#allocation5 + $0x48] sm:$0xff]  ;;  %p305_p2 = scmp.ne.s32.totalorder %s153_s12, %s304_s13  ;;  %p310_p4 = scmp.lt.s32.totalorder %s304_s13, %s304_s13 }
  0x2a   :  { %222 = vmatpush3.bf16.msra.mxu0 %v219_v3  ;;  %v231_v12 = vpack.c.bf16 %v52_v11, %v51_v10  ;;  %v235_v15 = vpack.c.bf16 %v54_v14, %v53_v13  ;;  %v55_v16 = vld [vmem:[#allocation5 + $0x50] sm:$0xff]  ;;  %v56_v17 = vld [vmem:[#allocation5 + $0x58] sm:$0xff]  ;;  %v57_v19 = vld [vmem:[#allocation5 + $0x60] sm:$0xff] }
  0x2b   :  { %224 = vmatprep.subr.bf16.mxu0 %v223_v5  ;;  %v239_v18 = vpack.c.bf16 %v56_v17, %v55_v16  ;;  %v58_v20 = vld [vmem:[#allocation5 + $0x68] sm:$0xff]  ;;  %v59_v22 = vld [vmem:[#allocation5 + $0x70] sm:$0xff]  ;;  %v60_v23 = vld [vmem:[#allocation5 + $0x78] sm:$0xff]  ;;  %p311_p5 = por %p310_p4, %p309_p3 }
  0x2c   :  { %v243_v21 = vpack.c.bf16 %v58_v20, %v57_v19  ;;  %v247_v24 = vpack.c.bf16 %v60_v23, %v59_v22  ;;  %v44_v25 = vld [vmem:[#allocation2 + $0x8] sm:$0xff]  ;;  %v165_v26 = vld [vmem:[%s407_s2] ss:$0 sm:$0xff] }
  0x2d   :  { %p312_p6 = pnand %p311_p5, %p305_p2 }
  0x2e   :  { %226 = vmatpush3.bf16.msra.mxu0 %v223_v5 }
  0x2f   :  { %228 = vmatprep.subr.bf16.mxu0 %v227_v8 }
  0x32   :  { %230 = vmatpush3.bf16.msra.mxu0 %v227_v8 }
  0x33   :  { %232 = vmatprep.subr.bf16.mxu0 %v231_v12 }
  0x36   :  { %234 = vmatpush3.bf16.msra.mxu0 %v231_v12 }
  0x37   :  { %236 = vmatprep.subr.bf16.mxu0 %v235_v15 }
  0x3a   :  { %238 = vmatpush3.bf16.msra.mxu0 %v235_v15 }
  0x3b   :  { %240 = vmatprep.subr.bf16.mxu0 %v239_v18 }
  0x3e   :  { %242 = vmatpush3.bf16.msra.mxu0 %v239_v18 }
  0x3f   :  { %244 = vmatprep.subr.bf16.mxu0 %v243_v21 }
  0x42   :  { %246 = vmatpush3.bf16.msra.mxu0 %v243_v21 }
  0x43   :  { %248 = vmatprep.subr.bf16.mxu0 %v247_v24 }
  0x46   :  { %250 = vmatpush3.bf16.msra.mxu0 %v247_v24 }
  0x49   :  { %217 = vmatmul.mubr.f32.vlgmr.msra.gmra.mrb[0].mxu0 %v44_v25 }
 0x11c   :  { %v218_v27 = vpop.f32.mrb[0].mxu0 }
 0x11d   :  { %v140_v28 = vadd.f32 %v218_v27, %v165_v26  ;;  %v134_v29 = vpop.f32.mrb[1].mxu0 }
 0x11e   :  { %v135_v30 = vadd.f32 %v165_v26, %v134_v29 }
 0x11f   :  { %256 = vtanh.f32 %v140_v28 }
 0x120   :  { %258 = vtanh.f32 %v135_v30 }
 0x129   :  { %v257_v31 = vpop.eup %256 }
 0x12a   :  { %v259_v32 = vpop.eup %258  ;;  %146 = vst [vmem:[#allocation7 + $0x8] sm:$0xff] %v257_v31 }
 0x12b   :  { %145 = vst [vmem:[#allocation7] sm:$0xff] %v259_v32 }
 0x12c   :  { %315 = shalt.err (!%p312_p6)
}
 0x12d   :  { %s316_s15 = scalar_lea.hbm %s408_s3, 256 }
 0x12e   :  { %p317_p7 = scmp.ne.s32.totalorder %s408_s3, %s316_s15  ;;  %p320_p8 = scmp.lt.u32.totalorder %s316_s15, %s408_s3 }
 0x130   :  { %p322_p9 = pnand %p320_p8, %p317_p7 }
 0x132   :  { %325 = shalt.err (!%p322_p9)
}
 0x133   :  { %158 = dma.vmem_to_hbm [thread:$0]  %s153_s12, 256, %s408_s3, [#allocation4], %s333_s22, %s333_s22, %s334_s23  }
 0x134   :  { %330 = dma.done.wait [#allocation4], 256  }
 0x135   :  { %331 = vsyncadd [#allocation4], 4294967040 }
 0x136   :  { %162 = vsyncpa [#allocation3], 1 }
 0x137   :  { %163 = vsyncpa [#allocation6], 1 }
 0x138   :  { %164 = vsyncpa [#allocation4], 1 }

// kernel: tpu_custom_call.1
= control target key start
LH: loop header
LB: loop body
LE: loop exit
PB: predicated region body
PF: predicated region fallthrough
CT: control target
= control target key end

     0   :  { %8 = vsyncpa [#allocation3], 0  ;;  %s405_s0 = inlined_call_operand.hbm [shape: f32[16,128], index: 0, kind: input, shape index: {}]   ;;  %s406_s1 = inlined_call_operand.hbm [shape: f32[128,128], index: 1, kind: input, shape index: {}]   ;;  %s407_s2 = inlined_call_operand.vmem [shape: f32[1,128], index: 2, kind: input, shape index: {}]   ;;  %s408_s3 = inlined_call_operand.hbm [shape: f32[16,128], index: 3, kind: output, shape index: {}]  }
   0x1   :  { %9 = vsyncpa [#allocation6], 0 }
   0x2   :  { %10 = vsyncpa [#allocation4], 0  ;;  %s332_s12 = smov [#allocation2]   ;;  %s260_s16 = scalar_lea.hbm %s405_s0, 256 }
   0x3   :  { %s16_s13 = sshll.u32 %s332_s12, 4  ;;  %p261_p0 = scmp.ne.s32.totalorder %s405_s0, %s260_s16  ;;  %s17_s13 = int_to_ptr.vmem [resolvable:$true] %s16_s13 }
   0x4   :  { %p264_p1 = scmp.lt.u32.totalorder %s260_s16, %s405_s0 }
   0x6   :  { %p266_p2 = pnand %p264_p1, %p261_p0 }
   0x8   :  { %269 = shalt.err (!%p266_p2)
}
   0x9   :  { %s270_s21 = scalar_lea.vmem %s17_s13, 256  ;;  %p275_p4 = scmp.lt.s32.totalorder %s17_s13, %s17_s13 }
   0xa   :  { %p271_p3 = scmp.ne.s32.totalorder %s17_s13, %s270_s21  ;;  %p276_p5 = scmp.lt.s32.totalorder %s270_s21, %s270_s21 }
   0xc   :  { %p277_p6 = por %p276_p5, %p275_p4 }
   0xe   :  { %p278_p7 = pnand %p277_p6, %p271_p3 }
  0x10   :  { %281 = shalt.err (!%p278_p7)
}
  0x11   :  { %s333_s22 = smov 128   ;;  %s334_s23 = smov 8  }
  0x12   :  { %22 = dma.hbm_to_vmem [thread:$0]  %s405_s0, 256, %s17_s13, [#allocation3], %s333_s22, %s333_s22, %s334_s23  }
  0x13   :  { %s335_s26 = smov [#allocation5]   ;;  %s282_s30 = scalar_lea.hbm %s406_s1, 2048 }
  0x14   :  { %s28_s27 = sshll.u32 %s335_s26, 4  ;;  %p283_p8 = scmp.ne.s32.totalorder %s406_s1, %s282_s30  ;;  %s29_s27 = int_to_ptr.vmem [resolvable:$true] %s28_s27 }
  0x15   :  { %p286_p9 = scmp.lt.u32.totalorder %s282_s30, %s406_s1 }
  0x17   :  { %p288_p10 = pnand %p286_p9, %p283_p8 }
  0x19   :  { %291 = shalt.err (!%p288_p10)
}
  0x1a   :  { %s292_s8 = scalar_lea.vmem %s29_s27, 2048  ;;  %p297_p12 = scmp.lt.s32.totalorder %s29_s27, %s29_s27 }
  0x1b   :  { %p293_p11 = scmp.ne.s32.totalorder %s29_s27, %s292_s8  ;;  %p298_p13 = scmp.lt.s32.totalorder %s292_s8, %s292_s8 }
  0x1d   :  { %p299_p0 = por %p298_p13, %p297_p12 }
  0x1f   :  { %p300_p1 = pnand %p299_p0, %p293_p11 }
  0x21   :  { %303 = shalt.err (!%p300_p1)
}
  0x22   :  { %34 = dma.hbm_to_vmem [thread:$0]  %s406_s1, 2048, %s29_s27, [#allocation6], %s333_s22, %s333_s22, %s334_s23  }
  0x23   :  { %326 = dma.done.wait [#allocation3], 256  }
  0x24   :  { %327 = vsyncadd [#allocation3], 4294967040 }
  0x25   :  { %328 = dma.done.wait [#allocation6], 2048  }
  0x26   :  { %329 = vsyncadd [#allocation6], 4294965248  ;;  %v45_v0 = vld [vmem:[#allocation5] sm:$0xff]  ;;  %v46_v1 = vld [vmem:[#allocation5 + $0x8] sm:$0xff]  ;;  %s336_s11 = smov [#allocation7]  }
  0x27   :  { %v47_v2 = vld [vmem:[#allocation5 + $0x10] sm:$0xff]  ;;  %v219_v3 = vpack.c.bf16 %v46_v1, %v45_v0  ;;  %v48_v4 = vld [vmem:[#allocation5 + $0x18] sm:$0xff]  ;;  %v49_v6 = vld [vmem:[#allocation5 + $0x20] sm:$0xff]  ;;  %s152_s12 = sshll.u32 %s336_s11, 4  ;;  %s153_s12 = int_to_ptr.vmem [resolvable:$true] %s152_s12 }
  0x28   :  { %v223_v5 = vpack.c.bf16 %v48_v4, %v47_v2  ;;  %v50_v7 = vld [vmem:[#allocation5 + $0x28] sm:$0xff]  ;;  %v43_v9 = vld [vmem:[#allocation2] sm:$0xff]  ;;  %v52_v11 = vld [vmem:[#allocation5 + $0x38] sm:$0xff]  ;;  %s304_s13 = scalar_lea.vmem %s153_s12, 256  ;;  %p309_p3 = scmp.lt.s32.totalorder %s153_s12, %s153_s12 }
  0x29   :  { %220 = vmatprep.subr.bf16.mxu0 %v219_v3  ;;  %v227_v8 = vpack.c.bf16 %v50_v7, %v49_v6  ;;  %v51_v10 = vld [vmem:[#allocation5 + $0x30] sm:$0xff]  ;;  %216 = vmatprep.mubr.f32.mxu0 %v43_v9  ;;  %v53_v13 = vld [vmem:[#allocation5 + $0x40] sm:$0xff]  ;;  %v54_v14 = vld [vmem:[#allocation5 + $0x48] sm:$0xff]  ;;  %p305_p2 = scmp.ne.s32.totalorder %s153_s12, %s304_s13  ;;  %p310_p4 = scmp.lt.s32.totalorder %s304_s13, %s304_s13 }
  0x2a   :  { %222 = vmatpush3.bf16.msra.mxu0 %v219_v3  ;;  %v231_v12 = vpack.c.bf16 %v52_v11, %v51_v10  ;;  %v235_v15 = vpack.c.bf16 %v54_v14, %v53_v13  ;;  %v55_v16 = vld [vmem:[#allocation5 + $0x50] sm:$0xff]  ;;  %v56_v17 = vld [vmem:[#allocation5 + $0x58] sm:$0xff]  ;;  %v57_v19 = vld [vmem:[#allocation5 + $0x60] sm:$0xff] }
  0x2b   :  { %224 = vmatprep.subr.bf16.mxu0 %v223_v5  ;;  %v239_v18 = vpack.c.bf16 %v56_v17, %v55_v16  ;;  %v58_v20 = vld [vmem:[#allocation5 + $0x68] sm:$0xff]  ;;  %v59_v22 = vld [vmem:[#allocation5 + $0x70] sm:$0xff]  ;;  %v60_v23 = vld [vmem:[#allocation5 + $0x78] sm:$0xff]  ;;  %p311_p5 = por %p310_p4, %p309_p3 }
  0x2c   :  { %v243_v21 = vpack.c.bf16 %v58_v20, %v57_v19  ;;  %v247_v24 = vpack.c.bf16 %v60_v23, %v59_v22  ;;  %v44_v25 = vld [vmem:[#allocation2 + $0x8] sm:$0xff]  ;;  %v165_v26 = vld [vmem:[%s407_s2] ss:$0 sm:$0xff] }
  0x2d   :  { %p312_p6 = pnand %p311_p5, %p305_p2 }
  0x2e   :  { %226 = vmatpush3.bf16.msra.mxu0 %v223_v5 }
  0x2f   :  { %228 = vmatprep.subr.bf16.mxu0 %v227_v8 }
  0x32   :  { %230 = vmatpush3.bf16.msra.mxu0 %v227_v8 }
  0x33   :  { %232 = vmatprep.subr.bf16.mxu0 %v231_v12 }
  0x36   :  { %234 = vmatpush3.bf16.msra.mxu0 %v231_v12 }
  0x37   :  { %236 = vmatprep.subr.bf16.mxu0 %v235_v15 }
  0x3a   :  { %238 = vmatpush3.bf16.msra.mxu0 %v235_v15 }
  0x3b   :  { %240 = vmatprep.subr.bf16.mxu0 %v239_v18 }
  0x3e   :  { %242 = vmatpush3.bf16.msra.mxu0 %v239_v18 }
  0x3f   :  { %244 = vmatprep.subr.bf16.mxu0 %v243_v21 }
  0x42   :  { %246 = vmatpush3.bf16.msra.mxu0 %v243_v21 }
  0x43   :  { %248 = vmatprep.subr.bf16.mxu0 %v247_v24 }
  0x46   :  { %250 = vmatpush3.bf16.msra.mxu0 %v247_v24 }
  0x49   :  { %217 = vmatmul.mubr.f32.vlgmr.msra.gmra.mrb[0].mxu0 %v44_v25 }
 0x11c   :  { %v218_v27 = vpop.f32.mrb[0].mxu0 }
 0x11d   :  { %v140_v28 = vadd.f32 %v218_v27, %v165_v26  ;;  %v134_v29 = vpop.f32.mrb[1].mxu0 }
 0x11e   :  { %v135_v30 = vadd.f32 %v165_v26, %v134_v29 }
 0x11f   :  { %256 = vtanh.f32 %v140_v28 }
 0x120   :  { %258 = vtanh.f32 %v135_v30 }
 0x129   :  { %v257_v31 = vpop.eup %256 }
 0x12a   :  { %v259_v32 = vpop.eup %258  ;;  %146 = vst [vmem:[#allocation7 + $0x8] sm:$0xff] %v257_v31 }
 0x12b   :  { %145 = vst [vmem:[#allocation7] sm:$0xff] %v259_v32 }
 0x12c   :  { %315 = shalt.err (!%p312_p6)
}
 0x12d   :  { %s316_s15 = scalar_lea.hbm %s408_s3, 256 }
 0x12e   :  { %p317_p7 = scmp.ne.s32.totalorder %s408_s3, %s316_s15  ;;  %p320_p8 = scmp.lt.u32.totalorder %s316_s15, %s408_s3 }
 0x130   :  { %p322_p9 = pnand %p320_p8, %p317_p7 }
 0x132   :  { %325 = shalt.err (!%p322_p9)
}
 0x133   :  { %158 = dma.vmem_to_hbm [thread:$0]  %s153_s12, 256, %s408_s3, [#allocation4], %s333_s22, %s333_s22, %s334_s23  }
 0x134   :  { %330 = dma.done.wait [#allocation4], 256  }
 0x135   :  { %331 = vsyncadd [#allocation4], 4294967040 }
 0x136   :  { %162 = vsyncpa [#allocation3], 1 }
 0x137   :  { %163 = vsyncpa [#allocation6], 1 }
 0x138   :  { %164 = vsyncpa [#allocation4], 1 }

</bundles_post_ra>
